<compile_context>
chip_gen: v7x
topology: tpu7x:2x2x1
jax: 0.10.0
libtpu: 0.0.40
codegen_flags: <defaults>
</compile_context>

<pallas_src>
import math

import jax
import jax.numpy as jnp
from jax import lax
from jax.experimental import pallas as pl
from jax.experimental.pallas import tpu as pltpu


def _attention_head_kernel(x_ref, wq_ref, wk_ref, wv_ref, o_ref):
    """Single grid step: whole problem resident in VMEM (a few KiB)."""
    B, S, E = x_ref.shape
    H = wq_ref.shape[1]

    # Flatten the batch for the projection: one 2-D (B*S, E) x (E, H) matmul per
    # weight instead of a B-batched dot_general (fewer MXU push/drain round-trips).
    x2d = x_ref[...].reshape(B * S, E)

    # wq_ref already carries the 1/sqrt(H) scale (folded at parameter-prep time).
    q = jnp.dot(x2d, wq_ref[...], preferred_element_type=jnp.float32).reshape(B, S, H)
    k = jnp.dot(x2d, wk_ref[...], preferred_element_type=jnp.float32).reshape(B, S, H)
    v = jnp.dot(x2d, wv_ref[...], preferred_element_type=jnp.float32).reshape(B, S, H)

    # Q @ K^T without materialising k.T: contract over the head dim, batched over B.
    scores = lax.dot_general(
        q, k,
        dimension_numbers=(((2,), (2,)), ((0,), (0,))),
        preferred_element_type=jnp.float32,
    )  # (B, S, S)

    # Causal (lower-triangular) mask via 2-D iota.  A large finite negative is used
    # instead of -inf so even a hypothetical fully-masked row cannot produce NaN;
    # exp(finfo.min - rowmax) underflows to exactly 0, matching -inf semantics.
    row = lax.broadcasted_iota(jnp.int32, (S, S), 0)
    col = lax.broadcasted_iota(jnp.int32, (S, S), 1)
    causal = (col <= row)[None, :, :]
    scores = jnp.where(causal, scores, jnp.finfo(jnp.float32).min)

    # Numerically stable softmax in f32; exact divide for parity with the module.
    m = jnp.max(scores, axis=-1, keepdims=True)
    e = jnp.exp(scores - m)
    attn = e / jnp.sum(e, axis=-1, keepdims=True)

    # TODO(synk): nn.Dropout(0.1) is identity in eval mode; training-mode dropout
    # (pltpu.prng_seed + pltpu.stateful_bernoulli) is intentionally omitted.

    # attn @ V, batched over B (this matmul genuinely needs the batch axis).
    out = lax.dot_general(
        attn, v,
        dimension_numbers=(((2,), (1,)), ((0,), (0,))),
        preferred_element_type=jnp.float32,
    )  # (B, S, H)
    o_ref[...] = out.astype(o_ref.dtype)


def prepare_attention_params(wq, wk, wv):
    """One-time parameter prep (NOT in the per-call hot path).

    Transposes PyTorch (H, E) Linear weights to (E, H) matmul layout and folds the
    1/sqrt(head_size) attention scale into the W_Q columns.
    """
    H = wq.shape[0]
    scale = 1.0 / math.sqrt(float(H))
    wq_t = (wq.T * scale).astype(jnp.float32)   # (E, H), scale folded in
    wk_t = wk.T.astype(jnp.float32)             # (E, H)
    wv_t = wv.T.astype(jnp.float32)             # (E, H)
    return wq_t, wk_t, wv_t


@jax.jit
def attention_head(embeddings, wq_t, wk_t, wv_t):
    """embeddings: (B, S, E) f32; wq_t/wk_t/wv_t: pre-transposed (E, H) weights."""
    B, S, E = embeddings.shape
    H = wq_t.shape[1]

    # Whole problem is a few KiB: single grid step, full-array VMEM blocks.
    # (If S/E/heads scale up: switch to a flash-style KV grid axis sized against
    #  v7x's 64 MiB VMEM, bf16 matmul operands with f32 accumulation, lane-dense
    #  multi-head output, and dimension_semantics=("parallel", ...) for the 2 TCs.)
    vmem_spec = pl.BlockSpec(memory_space=pltpu.MemorySpace.VMEM)
    return pl.pallas_call(
        _attention_head_kernel,
        out_shape=jax.ShapeDtypeStruct((B, S, H), embeddings.dtype),
        in_specs=[vmem_spec, vmem_spec, vmem_spec, vmem_spec],
        out_specs=vmem_spec,
    )(embeddings, wq_t, wk_t, wv_t)


def _xavier_uniform(key, shape):
    # Matches nn.init.xavier_uniform_ for a (fan_out, fan_in) Linear weight.
    fan_out, fan_in = shape
    bound = math.sqrt(6.0 / (fan_in + fan_out))
    return jax.random.uniform(key, shape, dtype=jnp.float32,
                              minval=-bound, maxval=bound)


def _reference(embeddings, wq, wk, wv):
    # Pure-JAX reference with identical semantics (eval-mode dropout = identity).
    q = embeddings @ wq.T
    k = embeddings @ wk.T
    v = embeddings @ wv.T
    H = wq.shape[0]
    scores = (q @ jnp.swapaxes(k, -2, -1)) / jnp.sqrt(jnp.float32(H))
    S = embeddings.shape[1]
    mask = jnp.tril(jnp.ones((S, S), dtype=bool))
    scores = jnp.where(mask, scores, -jnp.inf)
    attn = jax.nn.softmax(scores, axis=-1)
    return attn @ v


if __name__ == "__main__":
    # Small shapes implied by the module's forward: (batch, seq, embedding_dim).
    B, S, E, H = 2, 8, 32, 16

    key = jax.random.PRNGKey(0)
    kx, kq, kk, kv = jax.random.split(key, 4)

    embeddings = jax.random.normal(kx, (B, S, E), dtype=jnp.float32)
    wq = _xavier_uniform(kq, (H, E))  # PyTorch Linear weight layout (out, in)
    wk = _xavier_uniform(kk, (H, E))
    wv = _xavier_uniform(kv, (H, E))

    # One-time weight prep (outside the per-call hot path).
    wq_t, wk_t, wv_t = prepare_attention_params(wq, wk, wv)

    out = attention_head(embeddings, wq_t, wk_t, wv_t)
    out = jax.block_until_ready(out)

    ref = _reference(embeddings, wq, wk, wv)
    assert out.shape == (B, S, H)
    assert jnp.allclose(out, ref, atol=1e-4, rtol=1e-4), "mismatch vs reference"

    print("KERNEL_OK")
</pallas_src>

<mosaic_0001>
module attributes {stable_mosaic.version = 11 : i64} {
  func.func @_attention_head_kernel(%arg0: memref<2x8x32xf32, #tpu.memory_space<vmem>>, %arg1: memref<32x16xf32, #tpu.memory_space<vmem>>, %arg2: memref<32x16xf32, #tpu.memory_space<vmem>>, %arg3: memref<32x16xf32, #tpu.memory_space<vmem>>, %arg4: memref<2x8x16xf32, #tpu.memory_space<vmem>>) attributes {dimension_semantics = [], scalar_prefetch = 0 : i64, scratch_operands = 0 : i64, tpu.core_type = #tpu.core_type<tc>} {
    %c0 = arith.constant 0 : index
    %c0_0 = arith.constant 0 : index
    %c0_1 = arith.constant 0 : index
    %0 = vector.load %arg0[%c0, %c0_0, %c0_1] : memref<2x8x32xf32, #tpu.memory_space<vmem>>, vector<2x8x32xf32>
    %1 = vector.shape_cast %0 : vector<2x8x32xf32> to vector<16x32xf32>
    %c0_2 = arith.constant 0 : index
    %c0_3 = arith.constant 0 : index
    %2 = vector.load %arg1[%c0_2, %c0_3] : memref<32x16xf32, #tpu.memory_space<vmem>>, vector<32x16xf32>
    %cst = arith.constant dense<0.000000e+00> : vector<16x16xf32>
    %3 = tpu.matmul %1, %2, %cst {dimension_numbers = #tpu.dot_dimension_numbers<[1], [0], [0], [1], [0, 0, 1, 1], [], []>} : vector<16x32xf32>, vector<32x16xf32>, vector<16x16xf32> -> vector<16x16xf32>
    %4 = vector.shape_cast %3 : vector<16x16xf32> to vector<2x8x16xf32>
    %c0_4 = arith.constant 0 : index
    %c0_5 = arith.constant 0 : index
    %5 = vector.load %arg2[%c0_4, %c0_5] : memref<32x16xf32, #tpu.memory_space<vmem>>, vector<32x16xf32>
    %cst_6 = arith.constant dense<0.000000e+00> : vector<16x16xf32>
    %6 = tpu.matmul %1, %5, %cst_6 {dimension_numbers = #tpu.dot_dimension_numbers<[1], [0], [0], [1], [0, 0, 1, 1], [], []>} : vector<16x32xf32>, vector<32x16xf32>, vector<16x16xf32> -> vector<16x16xf32>
    %7 = vector.shape_cast %6 : vector<16x16xf32> to vector<2x8x16xf32>
    %c0_7 = arith.constant 0 : index
    %c0_8 = arith.constant 0 : index
    %8 = vector.load %arg3[%c0_7, %c0_8] : memref<32x16xf32, #tpu.memory_space<vmem>>, vector<32x16xf32>
    %cst_9 = arith.constant dense<0.000000e+00> : vector<16x16xf32>
    %9 = tpu.matmul %1, %8, %cst_9 {dimension_numbers = #tpu.dot_dimension_numbers<[1], [0], [0], [1], [0, 0, 1, 1], [], []>} : vector<16x32xf32>, vector<32x16xf32>, vector<16x16xf32> -> vector<16x16xf32>
    %10 = vector.shape_cast %9 : vector<16x16xf32> to vector<2x8x16xf32>
    %cst_10 = arith.constant dense<0.000000e+00> : vector<2x8x8xf32>
    %11 = tpu.matmul %4, %7, %cst_10 {dimension_numbers = #tpu.dot_dimension_numbers<[2], [2], [1], [1], [0, 0, 0, 1, 1, 1], [0], [0]>} : vector<2x8x16xf32>, vector<2x8x16xf32>, vector<2x8x8xf32> -> vector<2x8x8xf32>
    %12 = tpu.iota {dimensions = array<i32: 0>} : vector<8x8xi32>
    %13 = tpu.iota {dimensions = array<i32: 1>} : vector<8x8xi32>
    %14 = arith.cmpi sle, %13, %12 : vector<8x8xi32>
    %15 = vector.shape_cast %14 : vector<8x8xi1> to vector<1x8x8xi1>
    %cst_11 = arith.constant -3.40282347E+38 : f32
    %16 = vector.shape_cast %15 : vector<1x8x8xi1> to vector<1x8x8xi1>
    %17 = vector.broadcast %16 : vector<1x8x8xi1> to vector<2x8x8xi1>
    %18 = vector.broadcast %cst_11 : f32 to vector<2x8x8xf32>
    %19 = arith.select %17, %11, %18 : vector<2x8x8xi1>, vector<2x8x8xf32>
    %cst_12 = arith.constant dense<0xFF800000> : vector<2x8xf32>
    %20 = vector.multi_reduction <maximumf>, %19, %cst_12 [2] : vector<2x8x8xf32> to vector<2x8xf32>
    %21 = vector.shape_cast %20 : vector<2x8xf32> to vector<2x8x1xf32>
    %22 = vector.broadcast %21 : vector<2x8x1xf32> to vector<2x8x8xf32>
    %23 = arith.subf %19, %22 : vector<2x8x8xf32>
    %24 = math.exp %23 : vector<2x8x8xf32>
    %cst_13 = arith.constant dense<0.000000e+00> : vector<2x8xf32>
    %25 = vector.multi_reduction <add>, %24, %cst_13 [2] : vector<2x8x8xf32> to vector<2x8xf32>
    %26 = vector.shape_cast %25 : vector<2x8xf32> to vector<2x8x1xf32>
    %27 = vector.broadcast %26 : vector<2x8x1xf32> to vector<2x8x8xf32>
    %28 = arith.divf %24, %27 : vector<2x8x8xf32>
    %cst_14 = arith.constant dense<0.000000e+00> : vector<2x8x16xf32>
    %29 = tpu.matmul %28, %10, %cst_14 {dimension_numbers = #tpu.dot_dimension_numbers<[2], [1], [1], [2], [0, 0, 0, 1, 1, 2], [0], [0]>} : vector<2x8x8xf32>, vector<2x8x16xf32>, vector<2x8x16xf32> -> vector<2x8x16xf32>
    %c0_15 = arith.constant 0 : index
    %c0_16 = arith.constant 0 : index
    %c0_17 = arith.constant 0 : index
    %30 = vector.load %arg4[%c0_15, %c0_16, %c0_17] : memref<2x8x16xf32, #tpu.memory_space<vmem>>, vector<2x8x16xf32>
    tpu.vector_store %arg4[%c0_15, %c0_16, %c0_17], %29 {strides = array<i32>} : memref<2x8x16xf32, #tpu.memory_space<vmem>>, vector<2x8x16xf32>,
    return
  }
}

</mosaic_0001>

<bundles_post_ra>
// kernel: attention_head.1
= control target key start
LH: loop header
LB: loop body
LE: loop exit
PB: predicated region body
PF: predicated region fallthrough
CT: control target
= control target key end

     0   :  { %vm24_vm0 = vcmask 261120   ;;  %s871_s0 = inlined_call_operand.vmem [shape: f32[2,8,32], index: 0, kind: input, shape index: {}]   ;;  %s872_s1 = inlined_call_operand.vmem [shape: f32[32,16], index: 1, kind: input, shape index: {}]   ;;  %s873_s2 = inlined_call_operand.vmem [shape: f32[32,16], index: 2, kind: input, shape index: {}]   ;;  %s874_s3 = inlined_call_operand.vmem [shape: f32[32,16], index: 3, kind: input, shape index: {}]   ;;  %s875_s4 = inlined_call_operand.hbm [shape: f32[2,8,16], index: 4, kind: output, shape index: {}]  }
   0x1   :  { %v106_v0 = vld [vmem:[%s873_s2] sm:$0xff]  ;;  %v107_v1 = vld [vmem:[%s873_s2 + $0x8] sm:$0xff]  ;;  %v108_v5 = vld [vmem:[%s873_s2 + $0x10] sm:$0xff] }
   0x2   :  { %v20_v2 = vld [vmem:[%s872_s1] sm:$0xff]  ;;  %v712_v3 = vpack.c.bf16 %v107_v1, %v106_v0  ;;  %v21_v4 = vld [vmem:[%s872_s1 + $0x8] sm:$0xff]  ;;  %v109_v6 = vld [vmem:[%s873_s2 + $0x18] sm:$0xff] }
   0x3   :  { %v704_v7 = vpack.c.bf16 %v21_v4, %v20_v2  ;;  %v716_v8 = vpack.c.bf16 %v109_v6, %v108_v5  ;;  %v22_v9 = vld [vmem:[%s872_s1 + $0x10] sm:$0xff]  ;;  %v23_v10 = vld [vmem:[%s872_s1 + $0x18] sm:$0xff]  ;;  %v18_v11 = vld [vmem:[%s871_s0] sm:$0xff] }
   0x4   :  { %713 = vmatprep.subr.bf16.mxu1 %v712_v3  ;;  %v708_v12 = vpack.c.bf16 %v23_v10, %v22_v9  ;;  %670 = vmatprep.mubr.msk.f32.mxu1 %vm24_vm0, %v18_v11 }
   0x5   :  { %9 = vsyncpa [#allocation3], 0  ;;  %715 = vmatpush3.bf16.msra.mxu1 %v712_v3  ;;  %705 = vmatprep.subr.bf16.mxu0 %v704_v7  ;;  %v19_v13 = vld [vmem:[%s871_s0 + $0x8] sm:$0xff]  ;;  %v765_v14 = vmov 0.0   ;;  %vm766_vm1 = vmmov 0   ;;  %vm264_vm2 = vcmask 130048   ;;  %v417_v25 = vlaneseq }
   0x6   :  { %707 = vmatpush3.bf16.msra.mxu0 %v704_v7  ;;  %717 = vmatprep.subr.bf16.mxu1 %v716_v8  ;;  %v185_v19 = vld [vmem:[%s874_s3] sm:$0xff]  ;;  %v186_v20 = vld [vmem:[%s874_s3 + $0x8] sm:$0xff]  ;;  %v187_v21 = vld [vmem:[%s874_s3 + $0x10] sm:$0xff]  ;;  %vm426_vm4 = vcmask 64512  }
   0x7   :  { %709 = vmatprep.subr.bf16.mxu0 %v708_v12  ;;  %659 = vmatprep.mubr.msk.f32.mxu0 %vm24_vm0, %v18_v11  ;;  %v720_v22 = vpack.c.bf16 %v186_v20, %v185_v19  ;;  %v188_v23 = vld [vmem:[%s874_s3 + $0x18] sm:$0xff]  ;;  %v418_v26 = vshrl.u32 %v417_v25, 7  ;;  %v420_v27 = vand.u32 127, %v417_v25  ;;  %s767_s3 = smov [#allocation2]  }
   0x8   :  { %v724_v24 = vpack.c.bf16 %v188_v23, %v187_v21  ;;  %s602_s14 = sshll.u32 %s767_s3, 4  ;;  %s603_s14 = int_to_ptr.vmem [resolvable:$true] %s602_s14 }
   0x9   :  { %719 = vmatpush3.bf16.msra.mxu1 %v716_v8  ;;  %vm421_vm3 = vcmp.le.s32.totalorder %v420_v27, %v418_v26  ;;  %s741_s15 = scalar_lea.vmem %s603_s14, 256  ;;  %p746_p1 = scmp.lt.s32.totalorder %s603_s14, %s603_s14 }
   0xa   :  { %711 = vmatpush3.bf16.msra.mxu0 %v708_v12  ;;  %684 = vmatprep.subr.mxu1 %v765_v14  ;;  %p742_p0 = scmp.ne.s32.totalorder %s603_s14, %s741_s15  ;;  %p747_p2 = scmp.lt.s32.totalorder %s741_s15, %s741_s15 }
   0xb   :  { %721 = vmatprep.subr.bf16.mxu0 %v720_v22 }
   0xc   :  { %671 = vmatmul.mubr.msk.f32.vlgmr.msra.gmra.mrb[0].mxu1 %vm24_vm0, %v19_v13  ;;  %p748_p3 = por %p747_p2, %p746_p1 }
   0xd   :  { %660 = vmatmul.mubr.msk.f32.vlgmr.msra.gmra.mrb[0].mxu0 %vm24_vm0, %v19_v13  ;;  %686 = vmatprep.mubr.msk.f32.mxu1 %vm766_vm1, %v765_v14 }
   0xe   :  { %681 = vmatprep.mubr.msk.f32.mxu0 %vm24_vm0, %v18_v11  ;;  %723 = vmatpush3.bf16.msra.mxu0 %v720_v22  ;;  %p749_p4 = pnand %p748_p3, %p742_p0 }
   0xf   :  { %725 = vmatprep.subr.bf16.mxu0 %v724_v24 }
  0x12   :  { %727 = vmatpush3.bf16.msra.mxu0 %v724_v24 }
  0x13   :  { %694 = vmatprep.subr.mxu0 %v765_v14 }
  0x15   :  { %682 = vmatmul.mubr.msk.f32.vlgmr.msra.gmra.mrb[2].mxu0 %vm24_vm0, %v19_v13 }
  0x16   :  { %696 = vmatprep.mubr.msk.f32.mxu0 %vm766_vm1, %v765_v14 }
  0xdf   :  { %v672_v15 = vpop.f32.mrb[0].mxu1 }
  0xe0   :  { %v176_v16 = vpop.f32.mrb[1].mxu1  ;;  %v661_v17 = vpop.f32.mrb[0].mxu0 }
  0xe1   :  { %685 = vmatpush3.xpose.msk.msra.mxu1 %vm264_vm2, %v176_v16  ;;  %v97_v18 = vpop.f32.mrb[1].mxu0 }
  0xe2   :  { %689 = vmatprep.subr.mxu1 %v765_v14 }
  0xe4   :  { %687 = vmatmul.mubr.msk.f32.vlgmr.msra.gmra.mrb[2].mxu1 %vm264_vm2, %v97_v18 }
  0xe5   :  { %690 = vmatpush3.xpose.msk.msra.mxu1 %vm264_vm2, %v672_v15  ;;  %691 = vmatprep.mubr.msk.f32.mxu1 %vm766_vm1, %v765_v14 }
  0xe6   :  { %699 = vmatprep.subr.mxu1 %v765_v14 }
  0xe8   :  { %692 = vmatmul.mubr.msk.f32.vlgmr.msra.gmra.mrb[4].mxu1 %vm264_vm2, %v661_v17  ;;  %v683_v46 = vpop.f32.mrb[2].mxu0 }
  0xe9   :  { %701 = vmatprep.mubr.msk.f32.mxu1 %vm766_vm1, %v765_v14  ;;  %v255_v47 = vpop.f32.mrb[3].mxu0  ;;  %700 = vmatpush3.msra.mxu1 %v683_v46 }
  0xea   :  { %695 = vmatpush3.msra.mxu0 %v255_v47 }
 0x1b7   :  { %v337_v28 = vpop.f32.mrb[2].mxu1 }
 0x1b8   :  { %v424_v29 = vsel %vm421_vm3, %v337_v28, -3.4028235e+38  ;;  %v688_v30 = vpop.f32.mrb[3].mxu1 }
 0x1b9   :  { %v427_v31 = vsel %vm426_vm4, %v424_v29, -inf }
 0x1ba   :  { %428 = vmax.xlane.f32.xlu0 %v427_v31 }
 0x1bb   :  { %v413_v32 = vpop.f32.mrb[4].mxu1 }
 0x1bc   :  { %v425_v33 = vsel %vm421_vm3, %v413_v32, -3.4028235e+38  ;;  %v693_v34 = vpop.f32.mrb[5].mxu1 }
 0x1bd   :  { %v430_v35 = vsel %vm426_vm4, %v425_v33, -inf }
 0x1be   :  { %431 = vmax.xlane.f32.xlu0 %v430_v35 }
 0x247   :  { %v429_v36 = vpop.xlane.xlu0 %428 }
 0x248   :  { %v433_v37 = vsub.f32 %v424_v29, %v429_v36 }
 0x24a   :  { %v435_v38 = vmul.f32 1.442695, %v433_v37 }
 0x24b   :  { %v432_v39 = vpop.xlane.xlu0 %431 }
 0x24c   :  { %733 = vpow2.f32 %v435_v38  ;;  %v434_v40 = vsub.f32 %v425_v33, %v432_v39 }
 0x24e   :  { %v437_v41 = vmul.f32 1.442695, %v434_v40 }
 0x250   :  { %735 = vpow2.f32 %v437_v41 }
 0x256   :  { %v734_v42 = vpop.eup %733 }
 0x257   :  { %v439_v43 = vsel %vm426_vm4, %v734_v42, 0.0 }
 0x258   :  { %440 = vadd.xlane.f32.xlu1 %v439_v43 }
 0x25a   :  { %v736_v44 = vpop.eup %735 }
 0x25b   :  { %v442_v45 = vsel %vm426_vm4, %v736_v44, 0.0 }
 0x25c   :  { %443 = vadd.xlane.f32.xlu1 %v442_v45 }
 0x2e5   :  { %v441_v48 = vpop.xlane.xlu1 %440 }
 0x2e6   :  { %737 = vrcp.f32 %v441_v48 }
 0x2e9   :  { %v444_v49 = vpop.xlane.xlu1 %443 }
 0x2ea   :  { %739 = vrcp.f32 %v444_v49 }
 0x2f0   :  { %v738_v50 = vpop.eup %737 }
 0x2f1   :  { %v446_v51 = vmul.f32 %v738_v50, %v734_v42 }
 0x2f3   :  { %697 = vmatmul.mubr.msk.f32.vlgmr.msra.gmra.mrb[4].mxu0 %vm426_vm4, %v446_v51 }
 0x2f4   :  { %v740_v52 = vpop.eup %739 }
 0x2f5   :  { %v448_v53 = vmul.f32 %v740_v52, %v736_v44 }
 0x2f7   :  { %702 = vmatmul.mubr.msk.f32.vlgmr.msra.gmra.mrb[6].mxu1 %vm426_vm4, %v448_v53 }
 0x3c6   :  { %v518_v54 = vpop.f32.mrb[4].mxu0 }
 0x3c7   :  { %595 = vst.msk [vmem:[#allocation2] sm:$0xff] %vm264_vm2, %v518_v54  ;;  %v698_v55 = vpop.f32.mrb[5].mxu0 }
 0x3ca   :  { %v591_v56 = vpop.f32.mrb[6].mxu1 }
 0x3cb   :  { %596 = vst.msk [vmem:[#allocation2 + $0x8] sm:$0xff] %vm264_vm2, %v591_v56  ;;  %v703_v57 = vpop.f32.mrb[7].mxu1 }
 0x3cc   :  { %752 = shalt.err (!%p749_p4)
}
 0x3cd   :  { %s753_s18 = scalar_lea.hbm %s875_s4, 256 }
 0x3ce   :  { %p754_p5 = scmp.ne.s32.totalorder %s875_s4, %s753_s18  ;;  %p757_p6 = scmp.lt.u32.totalorder %s753_s18, %s875_s4 }
 0x3d0   :  { %p759_p7 = pnand %p757_p6, %p754_p5 }
 0x3d2   :  { %762 = shalt.err (!%p759_p7)
}
 0x3d3   :  { %s768_s23 = smov 128   ;;  %s769_s24 = smov 8  }
 0x3d4   :  { %608 = dma.vmem_to_hbm [thread:$0]  %s603_s14, 256, %s875_s4, [#allocation3], %s768_s23, %s768_s23, %s769_s24  }
 0x3d5   :  { %763 = dma.done.wait [#allocation3], 256  }
 0x3d6   :  { %764 = vsyncadd [#allocation3], 4294967040 }
 0x3d7   :  { %612 = vsyncpa [#allocation3], 1 }

</bundles_post_ra>
